<compile_context>
chip_gen: v5e
topology: v5e:2x2
jax: 0.10.0
libtpu: 0.0.40
codegen_flags: <defaults>
</compile_context>

<pallas_src>
import jax
import jax.numpy as jnp
from jax.experimental import pallas as pl
from jax.experimental.pallas import tpu as pltpu

QUANTILES = (0.05, 0.5, 0.95)

LANE_W = 512             # lanes per row (multiple of 128)
MAX_TILE_R = 512         # rows per grid step (multiple of 16) -> 4 MiB input/step
MIN_TILE_R = 16          # keeps bf16 (16,128) tiling happy too
SMALL_N_THRESHOLD = 4096  # below this, fixed pallas_call overhead dwarfs the work


def _cdiv(a, b):
    return -(-a // b)


def _round_up(x, m):
    return _cdiv(x, m) * m


def _default_num_splits():
    # The megacore split only pays off on chips with 2 TensorCores per Pallas
    # device (v7x).  On v5e / v6e the leading "parallel" axis is just a serial
    # loop that shrinks per-core tiles, so default to 1 there.
    try:
        kind = jax.devices()[0].device_kind.lower()
    except Exception:
        return 1
    return 2 if "v7" in kind else 1


def _reference_loss(preds, target, quantiles=QUANTILES):
    # Pure-JAX reference mirroring the PyTorch forward exactly. preds: (N, Q).
    q = jnp.asarray(quantiles, dtype=jnp.float32)[None, :]
    errors = target.astype(jnp.float32)[:, None] - preds.astype(jnp.float32)
    losses = jnp.maximum((q - 1.0) * errors, q * errors)
    return jnp.mean(jnp.sum(losses, axis=1))


def _make_kernel(quantiles, lane_w):
    # Python floats -> compile-time scalar constants (no captured array const).
    q_list = [float(q) for q in quantiles]

    def kernel(preds_ref, target_ref, out_ref, acc_ref):
        step = pl.program_id(1)

        @pl.when(step == 0)
        def _init():
            acc_ref[...] = jnp.zeros_like(acc_ref)

        t = target_ref[...].astype(jnp.float32)              # (TILE_R, LANE_W)
        total = None
        for qi, q in enumerate(q_list):                      # unrolled; q is a scalar
            e = t - preds_ref[qi].astype(jnp.float32)        # (TILE_R, LANE_W)
            # Exactly torch.max((q - 1) * errors, q * errors).
            l = jnp.maximum((q - 1.0) * e, q * e)
            total = l if total is None else total + l
        # Sublane-only partial reduce into a tiny resident accumulator; the
        # cross-lane reduce is done once, outside the kernel, on LANE_W floats.
        acc_ref[...] += jnp.sum(total, axis=0, keepdims=True)

        @pl.when(step == pl.num_programs(1) - 1)
        def _finalize():
            # Lane-dense, (8,128)-aligned output block; row 0 carries the data.
            out_ref[...] = jnp.broadcast_to(acc_ref[...], (8, lane_w))[None]

    return kernel


def quantile_loss(preds, target, quantiles=QUANTILES, *, preds_transposed=False,
                  use_kernel=None, tile_r=None, num_splits=None):
    """Mean pinball loss.

    preds: (N, Q) array (PyTorch layout), or (Q, N) if preds_transposed=True.
    target: (N,) array.  Returns a scalar float32.
    """
    preds = jnp.asarray(preds)
    target = jnp.asarray(target).reshape(-1)
    if preds_transposed:
        q_count, n = preds.shape
    else:
        n, q_count = preds.shape
    assert q_count == len(quantiles)
    assert target.shape[0] == n

    if use_kernel is None:
        use_kernel = n >= SMALL_N_THRESHOLD
    if not use_kernel:
        p_nq = preds.T if preds_transposed else preds
        return _reference_loss(p_nq, target, quantiles)

    if num_splits is None:
        num_splits = _default_num_splits()
    num_splits = max(1, int(num_splits))

    rows = max(1, _cdiv(n, LANE_W))
    if tile_r is None:
        tile_r = _cdiv(rows, num_splits * 4)      # aim for >= ~4 steps per core
    tile_r = min(MAX_TILE_R, max(MIN_TILE_R, _round_up(int(tile_r), 16)))
    steps = max(1, _cdiv(rows, num_splits * tile_r))
    rows_pad = num_splits * steps * tile_r
    n_pad = rows_pad * LANE_W

    # Relayout to dense tiles in the input's native dtype (bf16 stays bf16).
    # When preds arrives as (N, Q) the transpose is the one unavoidable HBM
    # pass; the zero-pad and reshape fuse into it under jit.  Padded preds and
    # target are both zero -> errors = 0 -> loss contribution exactly 0.
    preds_qn = preds if preds_transposed else preds.T                  # (Q, N)
    preds_qn = jnp.pad(preds_qn, ((0, 0), (0, n_pad - n)))
    preds_3d = preds_qn.reshape(q_count, rows_pad, LANE_W)
    target_2d = jnp.pad(target, (0, n_pad - n)).reshape(rows_pad, LANE_W)

    partials = pl.pallas_call(
        _make_kernel(quantiles, LANE_W),
        out_shape=jax.ShapeDtypeStruct((num_splits, 8, LANE_W), jnp.float32),
        grid_spec=pltpu.PrefetchScalarGridSpec(
            num_scalar_prefetch=0,
            grid=(num_splits, steps),
            in_specs=[
                pl.BlockSpec((q_count, tile_r, LANE_W),
                             lambda c, i: (0, c * steps + i, 0)),
                pl.BlockSpec((tile_r, LANE_W),
                             lambda c, i: (c * steps + i, 0)),
            ],
            out_specs=pl.BlockSpec((1, 8, LANE_W), lambda c, i: (c, 0, 0)),
            scratch_shapes=[pltpu.VMEM((1, LANE_W), jnp.float32)],
        ),
        compiler_params=pltpu.CompilerParams(
            dimension_semantics=("parallel", "arbitrary"),
            vmem_limit_bytes=32 * 1024 * 1024,
        ),
    )(preds_3d, target_2d)

    # Per-core per-lane partial sums (row 0 of each split) -> mean over TRUE n.
    return jnp.sum(partials[:, 0, :]) / jnp.float32(n)


if __name__ == "__main__":
    key = jax.random.PRNGKey(0)
    k1, k2, k3, k4, k5, k6 = jax.random.split(key, 6)

    # Small shape consistent with the module: batch=8, Q=3 quantiles.
    n_small = 8
    preds_s = jax.random.normal(k1, (n_small, len(QUANTILES)), dtype=jnp.float32)
    target_s = jax.random.normal(k2, (n_small,), dtype=jnp.float32)
    loss_s = quantile_loss(preds_s, target_s, use_kernel=True)
    jax.block_until_ready(loss_s)
    ref_s = _reference_loss(preds_s, target_s)
    assert jnp.allclose(loss_s, ref_s, rtol=1e-5, atol=1e-5), (loss_s, ref_s)

    # Multi-step accumulation, zero-padded tail, explicit 2-way core split
    # (serial-but-correct on 1-TC chips), small tile to force >1 grid step.
    n_med = 40000
    preds_m = jax.random.normal(k3, (n_med, len(QUANTILES)), dtype=jnp.float32)
    target_m = jax.random.normal(k4, (n_med,), dtype=jnp.float32)
    loss_m = quantile_loss(preds_m, target_m, use_kernel=True,
                           tile_r=16, num_splits=2)
    jax.block_until_ready(loss_m)
    ref_m = _reference_loss(preds_m, target_m)
    assert jnp.allclose(loss_m, ref_m, rtol=1e-5, atol=1e-5), (loss_m, ref_m)

    # bf16 inputs: DMA'd as bf16, upcast to f32 inside the kernel.
    n_b = 3000
    preds_b = jax.random.normal(k5, (n_b, len(QUANTILES)), dtype=jnp.bfloat16)
    target_b = jax.random.normal(k6, (n_b,), dtype=jnp.bfloat16)
    loss_b = quantile_loss(preds_b, target_b, use_kernel=True)
    jax.block_until_ready(loss_b)
    ref_b = _reference_loss(preds_b, target_b)
    assert jnp.allclose(loss_b, ref_b, rtol=1e-4, atol=1e-4), (loss_b, ref_b)

    print("KERNEL_OK")
</pallas_src>

<mosaic_0001>
module attributes {stable_mosaic.version = 11 : i64} {
  func.func @kernel(%arg0: i32, %arg1: i32, %arg2: memref<3x16x512xf32, #tpu.memory_space<vmem>>, %arg3: memref<16x512xf32, #tpu.memory_space<vmem>>, %arg4: memref<1x8x512xf32, #tpu.memory_space<vmem>>, %arg5: memref<1x512xf32, #tpu.memory_space<vmem>>) attributes {dimension_semantics = [#tpu.dimension_semantics<parallel>, #tpu.dimension_semantics<arbitrary>], iteration_bounds = array<i64: 1, 1>, scalar_prefetch = 0 : i64, scratch_operands = 1 : i64, tpu.core_type = #tpu.core_type<tc>, window_params = [{transform_indices = @transform_0, window_bounds = array<i64: 3, 16, 512>}, {transform_indices = @transform_1, window_bounds = array<i64: 16, 512>}, {transform_indices = @transform_2, window_bounds = array<i64: 1, 8, 512>}]} {
    %c0_i32 = arith.constant 0 : i32
    %0 = arith.cmpi eq, %arg1, %c0_i32 : i32
    %1 = arith.extui %0 : i1 to i32
    %c0_i32_0 = arith.constant 0 : i32
    %2 = arith.cmpi ne, %1, %c0_i32_0 : i32
    scf.if %2 {
      %cst_21 = arith.constant 0.000000e+00 : f32
      %38 = vector.broadcast %cst_21 : f32 to vector<1x512xf32>
      %c0_22 = arith.constant 0 : index
      %c0_23 = arith.constant 0 : index
      %39 = vector.load %arg5[%c0_22, %c0_23] : memref<1x512xf32, #tpu.memory_space<vmem>>, vector<1x512xf32>
      tpu.vector_store %arg5[%c0_22, %c0_23], %38 {strides = array<i32>} : memref<1x512xf32, #tpu.memory_space<vmem>>, vector<1x512xf32>,
    } else {
    }
    %c0 = arith.constant 0 : index
    %c0_1 = arith.constant 0 : index
    %3 = vector.load %arg3[%c0, %c0_1] : memref<16x512xf32, #tpu.memory_space<vmem>>, vector<16x512xf32>
    %c0_2 = arith.constant 0 : index
    %c0_3 = arith.constant 0 : index
    %c0_4 = arith.constant 0 : index
    %4 = vector.load %arg2[%c0_2, %c0_3, %c0_4] : memref<3x16x512xf32, #tpu.memory_space<vmem>>, vector<1x16x512xf32>
    %5 = vector.shape_cast %4 : vector<1x16x512xf32> to vector<16x512xf32>
    %6 = arith.subf %3, %5 : vector<16x512xf32>
    %cst = arith.constant -0.949999988 : f32
    %7 = vector.broadcast %cst : f32 to vector<16x512xf32>
    %8 = arith.mulf %7, %6 : vector<16x512xf32>
    %cst_5 = arith.constant 5.000000e-02 : f32
    %9 = vector.broadcast %cst_5 : f32 to vector<16x512xf32>
    %10 = arith.mulf %9, %6 : vector<16x512xf32>
    %11 = arith.maximumf %8, %10 : vector<16x512xf32>
    %c1 = arith.constant 1 : index
    %c0_6 = arith.constant 0 : index
    %c0_7 = arith.constant 0 : index
    %12 = vector.load %arg2[%c1, %c0_6, %c0_7] : memref<3x16x512xf32, #tpu.memory_space<vmem>>, vector<1x16x512xf32>
    %13 = vector.shape_cast %12 : vector<1x16x512xf32> to vector<16x512xf32>
    %14 = arith.subf %3, %13 : vector<16x512xf32>
    %cst_8 = arith.constant -5.000000e-01 : f32
    %15 = vector.broadcast %cst_8 : f32 to vector<16x512xf32>
    %16 = arith.mulf %15, %14 : vector<16x512xf32>
    %cst_9 = arith.constant 5.000000e-01 : f32
    %17 = vector.broadcast %cst_9 : f32 to vector<16x512xf32>
    %18 = arith.mulf %17, %14 : vector<16x512xf32>
    %19 = arith.maximumf %16, %18 : vector<16x512xf32>
    %20 = arith.addf %11, %19 : vector<16x512xf32>
    %c2 = arith.constant 2 : index
    %c0_10 = arith.constant 0 : index
    %c0_11 = arith.constant 0 : index
    %21 = vector.load %arg2[%c2, %c0_10, %c0_11] : memref<3x16x512xf32, #tpu.memory_space<vmem>>, vector<1x16x512xf32>
    %22 = vector.shape_cast %21 : vector<1x16x512xf32> to vector<16x512xf32>
    %23 = arith.subf %3, %22 : vector<16x512xf32>
    %cst_12 = arith.constant -5.000000e-02 : f32
    %24 = vector.broadcast %cst_12 : f32 to vector<16x512xf32>
    %25 = arith.mulf %24, %23 : vector<16x512xf32>
    %cst_13 = arith.constant 0.949999988 : f32
    %26 = vector.broadcast %cst_13 : f32 to vector<16x512xf32>
    %27 = arith.mulf %26, %23 : vector<16x512xf32>
    %28 = arith.maximumf %25, %27 : vector<16x512xf32>
    %29 = arith.addf %20, %28 : vector<16x512xf32>
    %c0_14 = arith.constant 0 : index
    %c0_15 = arith.constant 0 : index
    %30 = vector.load %arg5[%c0_14, %c0_15] : memref<1x512xf32, #tpu.memory_space<vmem>>, vector<1x512xf32>
    %cst_16 = arith.constant dense<0.000000e+00> : vector<512xf32>
    %31 = vector.multi_reduction <add>, %29, %cst_16 [0] : vector<16x512xf32> to vector<512xf32>
    %32 = vector.shape_cast %31 : vector<512xf32> to vector<1x512xf32>
    %33 = arith.addf %30, %32 : vector<1x512xf32>
    %c0_17 = arith.constant 0 : index
    %c0_18 = arith.constant 0 : index
    %34 = vector.load %arg5[%c0_17, %c0_18] : memref<1x512xf32, #tpu.memory_space<vmem>>, vector<1x512xf32>
    tpu.vector_store %arg5[%c0_17, %c0_18], %33 {strides = array<i32>} : memref<1x512xf32, #tpu.memory_space<vmem>>, vector<1x512xf32>,
    %c0_i32_19 = arith.constant 0 : i32
    %35 = arith.cmpi eq, %arg1, %c0_i32_19 : i32
    %36 = arith.extui %35 : i1 to i32
    %c0_i32_20 = arith.constant 0 : i32
    %37 = arith.cmpi ne, %36, %c0_i32_20 : i32
    scf.if %37 {
      %c0_21 = arith.constant 0 : index
      %c0_22 = arith.constant 0 : index
      %38 = vector.load %arg5[%c0_21, %c0_22] : memref<1x512xf32, #tpu.memory_space<vmem>>, vector<1x512xf32>
      %39 = vector.shape_cast %38 : vector<1x512xf32> to vector<1x512xf32>
      %40 = vector.broadcast %39 : vector<1x512xf32> to vector<8x512xf32>
      %41 = vector.shape_cast %40 : vector<8x512xf32> to vector<1x8x512xf32>
      %c0_23 = arith.constant 0 : index
      %c0_24 = arith.constant 0 : index
      %c0_25 = arith.constant 0 : index
      %42 = vector.load %arg4[%c0_23, %c0_24, %c0_25] : memref<1x8x512xf32, #tpu.memory_space<vmem>>, vector<1x8x512xf32>
      tpu.vector_store %arg4[%c0_23, %c0_24, %c0_25], %41 {strides = array<i32>} : memref<1x8x512xf32, #tpu.memory_space<vmem>>, vector<1x8x512xf32>,
    } else {
    }
    return
  }
  func.func @transform_0(%arg0: i32, %arg1: i32) -> (i32, i32, i32) {
    %c1_i32 = arith.constant 1 : i32
    %0 = arith.muli %arg0, %c1_i32 : i32
    %1 = arith.addi %0, %arg1 : i32
    %c0_i32 = arith.constant 0 : i32
    %c0_i32_0 = arith.constant 0 : i32
    %c0_i32_1 = arith.constant 0 : i32
    return %c0_i32, %1, %c0_i32_0 : i32, i32, i32
  }
  func.func @transform_1(%arg0: i32, %arg1: i32) -> (i32, i32) {
    %c1_i32 = arith.constant 1 : i32
    %0 = arith.muli %arg0, %c1_i32 : i32
    %1 = arith.addi %0, %arg1 : i32
    %c0_i32 = arith.constant 0 : i32
    %c0_i32_0 = arith.constant 0 : i32
    return %1, %c0_i32 : i32, i32
  }
  func.func @transform_2(%arg0: i32, %arg1: i32) -> (i32, i32, i32) {
    %c0_i32 = arith.constant 0 : i32
    %c0_i32_0 = arith.constant 0 : i32
    %c0_i32_1 = arith.constant 0 : i32
    return %arg0, %c0_i32, %c0_i32_0 : i32, i32, i32
  }
}

</mosaic_0001>

<bundles_post_ra>
// kernel: tpu_custom_call.1
= control target key start
LH: loop header
LB: loop body
LE: loop exit
PB: predicated region body
PF: predicated region fallthrough
CT: control target
= control target key end

     0   :  { %7 = vsyncpa [#allocation4], 0  ;;  %s507_s0 = inlined_call_operand.hbm [shape: f32[3,16,512], index: 0, kind: input, shape index: {}]   ;;  %s508_s1 = inlined_call_operand.hbm [shape: f32[16,512], index: 1, kind: input, shape index: {}]   ;;  %s509_s2 = inlined_call_operand.hbm [shape: f32[1,8,512], index: 2, kind: output, shape index: {}]  }
   0x1   :  { %8 = vsyncpa [#allocation7], 0 }
   0x2   :  { %9 = vsyncpa [#allocation5], 0  ;;  %s19_s11 = sshll.u32 %s507_s0, 4  ;;  %s381_s12 = smov [#allocation3]   ;;  %s20_s11 = int_to_ptr.hbm [resolvable:$true] %s19_s11 }
   0x3   :  { %s21_s13 = sshll.u32 %s381_s12, 4  ;;  %s37_s16 = sshll.u32 %s508_s1, 4  ;;  %s22_s13 = int_to_ptr.vmem [resolvable:$true] %s21_s13  ;;  %s38_s16 = int_to_ptr.hbm [resolvable:$true] %s37_s16 }
   0x4   :  { %s382_s17 = smov 512   ;;  %s383_s18 = smov 32  }
   0x5   :  { %27 = dma.hbm_to_vmem [thread:$0]  %s20_s11, 3072, %s22_s13, [#allocation4], %s382_s17, %s382_s17, %s383_s18  }
   0x6   :  { %s384_s19 = smov [#allocation6]  }
   0x7   :  { %s39_s20 = sshll.u32 %s384_s19, 4  ;;  %s40_s20 = int_to_ptr.vmem [resolvable:$true] %s39_s20 }
   0x8   :  { %45 = dma.hbm_to_vmem [thread:$0]  %s38_s16, 1024, %s40_s20, [#allocation7], %s382_s17, %s382_s17, %s383_s18  }
   0x9   :  { %375 = dma.done.wait [#allocation4], 3072  }
   0xa   :  { %376 = vsyncadd [#allocation4], 4294964224 }
   0xb   :  { %377 = dma.done.wait [#allocation7], 1024  }
   0xc   :  { %378 = vsyncadd [#allocation7], 4294966272  ;;  %v62_v0 = vlaneseq  ;;  %v385_v2 = vmov 0.0   ;;  %v414_v3 = vld [vmem:[#allocation6] sm:$0xff]  ;;  %v416_v4 = vld [vmem:[#allocation6 + $0x8] sm:$0xff]  ;;  %vm249_vm1 = vcmask 1040384  }
   0xd   :  { %v418_v5 = vld [vmem:[#allocation6 + $0x10] sm:$0xff]  ;;  %v420_v6 = vld [vmem:[#allocation6 + $0x18] sm:$0xff]  ;;  %v422_v7 = vld [vmem:[#allocation6 + $0x20] sm:$0xff]  ;;  %vm251_vm2 = vcmask 1042434   ;;  %vm253_vm3 = vcmask 1041408   ;;  %s386_s0 = smov [#allocation8]  }
   0xe   :  { %vm408_vm0 = vcmp.lt.s32.totalorder %v62_v0, 512  ;;  %v424_v8 = vld [vmem:[#allocation6 + $0x28] sm:$0xff]  ;;  %v426_v9 = vld [vmem:[#allocation6 + $0x30] sm:$0xff]  ;;  %v428_v10 = vld [vmem:[#allocation6 + $0x38] sm:$0xff]  ;;  %s284_s1 = sshll.u32 %s386_s0, 4  ;;  %s286_s23 = sshll.u32 %s509_s2, 4  ;;  %s285_s1 = int_to_ptr.vmem [resolvable:$true] %s284_s1  ;;  %s287_s23 = int_to_ptr.hbm [resolvable:$true] %s286_s23 }
   0xf   :  { %66 = vst.msk [vmem:[#allocation2] sm:$0xf] %vm408_vm0, %v385_v2  ;;  %v75_v11 = vld [vmem:[#allocation3] sm:$0xff]  ;;  %v76_v12 = vld [vmem:[#allocation3 + $0x8] sm:$0xff]  ;;  %v77_v13 = vld [vmem:[#allocation3 + $0x10] sm:$0xff] }
  0x10   :  { %v78_v14 = vld [vmem:[#allocation3 + $0x18] sm:$0xff]  ;;  %v83_v15 = vsub.f32 %v414_v3, %v75_v11  ;;  %v79_v16 = vld [vmem:[#allocation3 + $0x20] sm:$0xff]  ;;  %v80_v17 = vld [vmem:[#allocation3 + $0x28] sm:$0xff]  ;;  %v84_v19 = vsub.f32 %v416_v4, %v76_v12  ;;  %v85_v20 = vsub.f32 %v418_v5, %v77_v13 }
  0x11   :  { %v81_v18 = vld [vmem:[#allocation3 + $0x30] sm:$0xff]  ;;  %v86_v21 = vsub.f32 %v420_v6, %v78_v14  ;;  %v82_v22 = vld [vmem:[#allocation3 + $0x38] sm:$0xff]  ;;  %v87_v23 = vsub.f32 %v422_v7, %v79_v16  ;;  %v88_v24 = vsub.f32 %v424_v8, %v80_v17  ;;  %v116_v30 = vld [vmem:[#allocation3 + $0x40] sm:$0xff] }
  0x12   :  { %v89_v25 = vsub.f32 %v426_v9, %v81_v18  ;;  %v437_v26 = vmul.f32 -0.95, %v83_v15  ;;  %v90_v27 = vsub.f32 %v428_v10, %v82_v22  ;;  %v440_v28 = vmul.f32 -0.95, %v84_v19  ;;  %v117_v31 = vld [vmem:[#allocation3 + $0x48] sm:$0xff]  ;;  %v118_v49 = vld [vmem:[#allocation3 + $0x50] sm:$0xff] }
  0x13   :  { %v442_v29 = vmul.f32 -0.95, %v85_v20  ;;  %v444_v32 = vmul.f32 -0.95, %v86_v21  ;;  %v446_v33 = vmul.f32 -0.95, %v87_v23  ;;  %v124_v41 = vsub.f32 %v414_v3, %v116_v30 }
  0x14   :  { %v448_v34 = vmul.f32 -0.95, %v88_v24  ;;  %v450_v35 = vmul.f32 -0.95, %v89_v25  ;;  %v452_v36 = vmul.f32 0.05, %v83_v15  ;;  %v125_v45 = vsub.f32 %v416_v4, %v117_v31 }
  0x15   :  { %v454_v37 = vmul.f32 0.05, %v84_v19  ;;  %v456_v38 = vmul.f32 0.05, %v85_v20  ;;  %v458_v39 = vmul.f32 0.05, %v86_v21  ;;  %v126_v58 = vsub.f32 %v418_v5, %v118_v49 }
  0x16   :  { %v460_v40 = vmul.f32 0.05, %v87_v23  ;;  %v463_v42 = vmul.f32 -0.95, %v90_v27  ;;  %v465_v43 = vmul.f32 0.05, %v88_v24  ;;  %v107_v47 = vmax.f32 %v437_v26, %v452_v36 }
  0x17   :  { %v467_v44 = vmul.f32 0.05, %v89_v25  ;;  %v470_v46 = vmul.f32 0.05, %v90_v27  ;;  %v108_v48 = vmax.f32 %v440_v28, %v454_v37  ;;  %v119_v50 = vld [vmem:[#allocation3 + $0x58] sm:$0xff]  ;;  %v120_v51 = vld [vmem:[#allocation3 + $0x60] sm:$0xff]  ;;  %v109_v52 = vmax.f32 %v442_v29, %v456_v38 }
  0x18   :  { %v110_v53 = vmax.f32 %v444_v32, %v458_v39  ;;  %v111_v54 = vmax.f32 %v446_v33, %v460_v40  ;;  %v121_v55 = vld [vmem:[#allocation3 + $0x68] sm:$0xff]  ;;  %v122_v56 = vld [vmem:[#allocation3 + $0x70] sm:$0xff]  ;;  %v123_v57 = vld [vmem:[#allocation3 + $0x78] sm:$0xff]  ;;  %v127_v59 = vsub.f32 %v420_v6, %v119_v50  ;;  %v128_v60 = vsub.f32 %v422_v7, %v120_v51 }
  0x19   :  { %v129_v61 = vsub.f32 %v424_v8, %v121_v55  ;;  %v130_v62 = vsub.f32 %v426_v9, %v122_v56  ;;  %v131_v63 = vsub.f32 %v428_v10, %v123_v57  ;;  %v132_v0 = vmul.f32 -0.5, %v124_v41  ;;  %v165_v28 = vld [vmem:[#allocation3 + $0x80] sm:$0xff]  ;;  %v166_v33 = vld [vmem:[#allocation3 + $0x88] sm:$0xff]  ;;  %v167_v36 = vld [vmem:[#allocation3 + $0x90] sm:$0xff] }
  0x1a   :  { %v133_v2 = vmul.f32 -0.5, %v125_v45  ;;  %v134_v11 = vmul.f32 -0.5, %v126_v58  ;;  %v135_v12 = vmul.f32 -0.5, %v127_v59  ;;  %v136_v13 = vmul.f32 -0.5, %v128_v60  ;;  %v168_v37 = vld [vmem:[#allocation3 + $0x98] sm:$0xff]  ;;  %v170_v49 = vld [vmem:[#allocation3 + $0xa8] sm:$0xff] }
  0x1b   :  { %v137_v14 = vmul.f32 -0.5, %v129_v61  ;;  %v138_v15 = vmul.f32 -0.5, %v130_v62  ;;  %v139_v16 = vmul.f32 -0.5, %v131_v63  ;;  %v140_v17 = vmul.f32 0.5, %v124_v41  ;;  %v171_v50 = vld [vmem:[#allocation3 + $0xb0] sm:$0xff]  ;;  %v172_v56 = vld [vmem:[#allocation3 + $0xb8] sm:$0xff] }
  0x1c   :  { %v141_v18 = vmul.f32 0.5, %v125_v45  ;;  %v142_v19 = vmul.f32 0.5, %v126_v58  ;;  %v143_v20 = vmul.f32 0.5, %v127_v59  ;;  %v144_v21 = vmul.f32 0.5, %v128_v60  ;;  %v169_v45 = vld [vmem:[#allocation3 + $0xa0] sm:$0xff] }
  0x1d   :  { %v145_v22 = vmul.f32 0.5, %v129_v61  ;;  %v146_v23 = vmul.f32 0.5, %v130_v62  ;;  %v147_v24 = vmul.f32 0.5, %v131_v63  ;;  %v148_v25 = vmax.f32 %v132_v0, %v140_v17 }
  0x1e   :  { %v149_v26 = vmax.f32 %v133_v2, %v141_v18  ;;  %v150_v27 = vmax.f32 %v134_v11, %v142_v19  ;;  %v112_v29 = vmax.f32 %v448_v34, %v465_v43  ;;  %v113_v30 = vmax.f32 %v450_v35, %v467_v44 }
  0x1f   :  { %v151_v31 = vmax.f32 %v135_v12, %v143_v20  ;;  %v152_v32 = vmax.f32 %v136_v13, %v144_v21  ;;  %v114_v38 = vmax.f32 %v463_v42, %v470_v46  ;;  %v153_v39 = vmax.f32 %v137_v14, %v145_v22 }
  0x20   :  { %v154_v40 = vmax.f32 %v138_v15, %v146_v23  ;;  %v155_v41 = vmax.f32 %v139_v16, %v147_v24  ;;  %v156_v51 = vadd.f32 %v148_v25, %v107_v47  ;;  %v157_v55 = vadd.f32 %v149_v26, %v108_v48 }
  0x21   :  { %v158_v34 = vadd.f32 %v150_v27, %v109_v52  ;;  %v159_v43 = vadd.f32 %v151_v31, %v110_v53  ;;  %v160_v35 = vadd.f32 %v152_v32, %v111_v54  ;;  %v173_v44 = vsub.f32 %v414_v3, %v165_v28 }
  0x22   :  { %v174_v57 = vsub.f32 %v416_v4, %v166_v33  ;;  %v175_v58 = vsub.f32 %v418_v5, %v167_v36  ;;  %v176_v42 = vsub.f32 %v420_v6, %v168_v37  ;;  %v177_v46 = vsub.f32 %v422_v7, %v169_v45 }
  0x23   :  { %v178_v59 = vsub.f32 %v424_v8, %v170_v49  ;;  %v179_v60 = vsub.f32 %v426_v9, %v171_v50  ;;  %v180_v47 = vsub.f32 %v428_v10, %v172_v56  ;;  %v181_v48 = vmul.f32 -0.05, %v173_v44 }
  0x24   :  { %v182_v52 = vmul.f32 -0.05, %v174_v57  ;;  %v183_v53 = vmul.f32 -0.05, %v175_v58  ;;  %v161_v54 = vadd.f32 %v153_v39, %v112_v29  ;;  %v184_v61 = vmul.f32 -0.05, %v176_v42 }
  0x25   :  { %v185_v3 = vmul.f32 -0.05, %v177_v46  ;;  %v186_v62 = vmul.f32 -0.05, %v178_v59  ;;  %v162_v4 = vadd.f32 %v154_v40, %v113_v30  ;;  %v187_v63 = vmul.f32 -0.05, %v179_v60 }
  0x26   :  { %v188_v5 = vmul.f32 -0.05, %v180_v47  ;;  %v189_v0 = vmul.f32 0.95, %v173_v44  ;;  %v163_v6 = vadd.f32 %v155_v41, %v114_v38  ;;  %v190_v2 = vmul.f32 0.95, %v174_v57 }
  0x27   :  { %v191_v7 = vmul.f32 0.95, %v175_v58  ;;  %v192_v11 = vmul.f32 0.95, %v176_v42  ;;  %v193_v8 = vmul.f32 0.95, %v177_v46 }
  0x28   :  { %v194_v12 = vmul.f32 0.95, %v178_v59  ;;  %v195_v9 = vmul.f32 0.95, %v179_v60  ;;  %v197_v13 = vmax.f32 %v181_v48, %v189_v0  ;;  %v196_v10 = vmul.f32 0.95, %v180_v47 }
  0x29   :  { %v198_v14 = vmax.f32 %v182_v52, %v190_v2  ;;  %v199_v15 = vmax.f32 %v183_v53, %v191_v7  ;;  %v200_v16 = vmax.f32 %v184_v61, %v192_v11  ;;  %v201_v17 = vmax.f32 %v185_v3, %v193_v8 }
  0x2a   :  { %v202_v18 = vmax.f32 %v186_v62, %v194_v12  ;;  %v203_v19 = vmax.f32 %v187_v63, %v195_v9  ;;  %v205_v20 = vadd.f32 %v197_v13, %v156_v51  ;;  %v204_v21 = vmax.f32 %v188_v5, %v196_v10 }
  0x2b   :  { %v206_v22 = vadd.f32 %v198_v14, %v157_v55  ;;  %v207_v23 = vadd.f32 %v199_v15, %v158_v34  ;;  %v208_v24 = vadd.f32 %v200_v16, %v159_v43  ;;  %v209_v25 = vadd.f32 %v201_v17, %v160_v35 }
  0x2c   :  { %v210_v26 = vadd.f32 %v202_v18, %v161_v54  ;;  %v211_v27 = vadd.f32 %v203_v19, %v162_v4  ;;  %v212_v28 = vadd.f32 %v204_v21, %v163_v6  ;;  %v213_v54 = vld [vmem:[#allocation2] sm:$0xf] }
  0x2d   :  { %v214_v29 = vadd.f32 %v209_v25, %v205_v20 }
  0x2e   :  { %v221_v30 = vadd.f32 %v210_v26, %v206_v22  ;;  %v228_v31 = vadd.f32 %v211_v27, %v207_v23  ;;  %v235_v32 = vadd.f32 %v212_v28, %v208_v24 }
  0x2f   :  { %v215_v33 = vrot.slane %v214_v29, 4 }
  0x30   :  { %v222_v36 = vrot.slane %v221_v30, 4  ;;  %v229_v37 = vrot.slane %v228_v31, 4  ;;  %v236_v38 = vrot.slane %v235_v32, 4 }
  0x31   :  { %v216_v39 = vadd.f32 %v215_v33, %v214_v29 }
  0x32   :  { %v223_v40 = vadd.f32 %v222_v36, %v221_v30  ;;  %v230_v41 = vadd.f32 %v229_v37, %v228_v31  ;;  %v237_v45 = vadd.f32 %v236_v38, %v235_v32 }
  0x33   :  { %v217_v49 = vrot.slane %v216_v39, 2 }
  0x34   :  { %v224_v50 = vrot.slane %v223_v40, 2  ;;  %v231_v51 = vrot.slane %v230_v41, 2  ;;  %v238_v55 = vrot.slane %v237_v45, 2 }
  0x35   :  { %v218_v34 = vadd.f32 %v217_v49, %v216_v39 }
  0x36   :  { %v225_v43 = vadd.f32 %v224_v50, %v223_v40  ;;  %v232_v56 = vadd.f32 %v231_v51, %v230_v41  ;;  %v239_v35 = vadd.f32 %v238_v55, %v237_v45 }
  0x37   :  { %v219_v44 = vrot.slane %v218_v34, 1 }
  0x38   :  { %v226_v57 = vrot.slane %v225_v43, 1  ;;  %v233_v58 = vrot.slane %v232_v56, 1  ;;  %v240_v42 = vrot.slane %v239_v35, 1 }
  0x39   :  { %v220_v46 = vadd.f32 %v219_v44, %v218_v34 }
  0x3a   :  { %v227_v59 = vadd.f32 %v226_v57, %v225_v43  ;;  %v234_v60 = vadd.f32 %v233_v58, %v232_v56  ;;  %v241_v47 = vadd.f32 %v240_v42, %v239_v35 }
  0x3c   :  { %v246_v48 = vrot.slane %v227_v59, 7  ;;  %v247_v52 = vrot.slane %v234_v60, 6  ;;  %v248_v53 = vrot.slane %v241_v47, 5 }
  0x3e   :  { %v250_v61 = vsel %vm249_vm1, %v220_v46, %v246_v48  ;;  %v252_v3 = vsel %vm251_vm2, %v247_v52, %v248_v53 }
  0x3f   :  { %v254_v62 = vsel %vm253_vm3, %v250_v61, %v252_v3 }
  0x40   :  { %v256_v4 = vadd.f32 %v254_v62, %v213_v54 }
  0x42   :  { %261 = vst.msk [vmem:[#allocation2] sm:$0xf] %vm408_vm0, %v256_v4 }
  0x49   :  { %v265_v63 = vld [vmem:[#allocation2] sm:$0xf] }
  0x4a   :  { %v267_v5 = vperm.slane %v265_v63, 0  ;;  %v268_v0 = vperm.slane %v265_v63, 1  ;;  %v269_v6 = vperm.slane %v265_v63, 2  ;;  %v270_v2 = vperm.slane %v265_v63, 3 }
  0x4c   :  { %275 = vst [vmem:[#allocation8] sm:$0xff] %v267_v5 }
  0x4d   :  { %276 = vst [vmem:[#allocation8 + $0x8] sm:$0xff] %v268_v0 }
  0x4e   :  { %277 = vst [vmem:[#allocation8 + $0x10] sm:$0xff] %v269_v6 }
  0x4f   :  { %278 = vst [vmem:[#allocation8 + $0x18] sm:$0xff] %v270_v2 }
  0x50   :  { %289 = dma.vmem_to_hbm [thread:$0]  %s285_s1, 512, %s287_s23, [#allocation5]  }
  0x51   :  { %379 = dma.done.wait [#allocation5], 512  }
  0x52   :  { %380 = vsyncadd [#allocation5], 4294966784 }
  0x53   :  { %294 = vsyncpa [#allocation4], 1 }
  0x54   :  { %295 = vsyncpa [#allocation7], 1 }
  0x55   :  { %296 = vsyncpa [#allocation5], 1 }

</bundles_post_ra>
